<compile_context>
chip_gen: v5e
topology: v5e:2x2
jax: 0.10.0
libtpu: 0.0.40
codegen_flags: <defaults>
</compile_context>

<pallas_src>
import numpy as np
import jax
import jax.numpy as jnp
from jax import lax
from jax.experimental import pallas as pl
from jax.experimental.pallas import tpu as pltpu


# ----------------------------------------------------------------------------
# Host-side glue: build the D x D gate matrices exactly as Model3 does
# (deterministic numpy; Pallas TPU has no complex dtype, hence the re/im split)
# ----------------------------------------------------------------------------
def gellmann(mtx_id, d, j, k):
    """Generalized Gell-Mann generators (1-indexed levels, as in QuForge ops.Rot)."""
    m = np.zeros((d, d), dtype=np.complex128)
    if mtx_id == 0:          # symmetric
        m[j - 1, k - 1] = 1.0
        m[k - 1, j - 1] = 1.0
    elif mtx_id == 1:        # antisymmetric
        m[j - 1, k - 1] = -1.0j
        m[k - 1, j - 1] = 1.0j
    else:                    # diagonal (mtx_id == 2), j in [1, d-1]
        coef = np.sqrt(2.0 / (j * (j + 1)))
        for q in range(j):
            m[q, q] = coef
        m[j, j] = -j * coef
    return m


def rot_matrix(lam, theta):
    """exp(-i * theta/2 * lam) for Hermitian lam, via eigendecomposition."""
    e, V = np.linalg.eigh(lam)
    return (V * np.exp(-0.5j * theta * e)) @ V.conj().T


def embed_single(R, idx, n, d):
    """kron(I_{d^idx}, R, I_{d^(n-idx-1)}): gate on qudit `idx` (qudit 0 = MSB)."""
    left = np.eye(d ** idx, dtype=np.complex128)
    right = np.eye(d ** (n - idx - 1), dtype=np.complex128)
    return np.kron(np.kron(left, R), right)


def cnot_matrix(control, target, n, d):
    """Generalized CNOT: |a>_c |b>_t -> |a>_c |(b+a) mod d>_t (permutation matrix)."""
    D = d ** n
    M = np.zeros((D, D), dtype=np.complex128)
    for x in range(D):
        digits = [(x // d ** (n - 1 - q)) % d for q in range(n)]
        nd = list(digits)
        nd[target] = (digits[target] + digits[control]) % d
        y = 0
        for q in range(n):
            y = y * d + nd[q]
        M[y, x] = 1.0
    return M


def build_model3_gates(n, l, dim, thetas):
    """Raw per-module gate sequence mirroring Model3.__init__ (order preserved;
    np.random drives the random circuit structure)."""
    gates = []
    t = 0
    for _ in range(l):
        for j in range(n):
            mdx = np.random.choice(3)
            if mdx == 2:
                d1 = np.random.choice(dim - 1) + 1
                lam = gellmann(2, dim, d1, 0)
            else:
                d2 = np.random.choice(dim - 1) + 2
                d1 = np.random.choice(d2 - 1) + 1
                lam = gellmann(mdx, dim, d1, d2)
            R = rot_matrix(lam, thetas[t]); t += 1
            gates.append(embed_single(R, j, n, dim))
        for j in range(n):
            for k in range(n):
                if j != k:
                    gates.append(cnot_matrix(j, k, n, dim))
    # ops.prob(range(n)) == |psi|^2 is computed inside the kernel.
    return gates


def fuse_layers(gates, n, l):
    """Fuse each layer: one composite Rot matrix + one composite CNOT
    permutation (exact matrix products, applied in the original order)."""
    D = gates[0].shape[0]
    per_layer = n + n * (n - 1)
    fused = []
    for li in range(l):
        base = li * per_layer
        rot = np.eye(D, dtype=np.complex128)
        for g in gates[base: base + n]:            # later gates multiply on the left
            rot = g @ rot
        cnot = np.eye(D, dtype=np.complex128)
        for g in gates[base + n: base + per_layer]:
            cnot = g @ cnot
        fused.append(rot)
        fused.append(cnot)
    return fused                                    # length 2*l


def pack_gates(fused):
    """Pre-transpose (kernel does psi_row @ G^T) and pack re/im: (L, 2, D, D) f32."""
    Gt = np.stack([g.T for g in fused])             # (L, D, D) complex
    packed = np.stack([Gt.real, Gt.imag], axis=1).astype(np.float32)
    return jnp.asarray(packed)


# ----------------------------------------------------------------------------
# Pallas kernel: single invocation, whole gate stack resident in VMEM,
# fully-unrolled complex matvec chain carried in vregs, final |psi|^2.
# ----------------------------------------------------------------------------
def circuit_kernel(gates_ref, out_ref):
    L = gates_ref.shape[0]
    D = gates_ref.shape[-1]

    # |0...0> synthesized in-kernel (no s0 inputs, no scratch).
    col = lax.broadcasted_iota(jnp.int32, (1, D), 1)
    re = jnp.where(col == 0, 1.0, 0.0).astype(jnp.float32)
    im = jnp.zeros((1, D), jnp.float32)

    # L is small after host-side layer fusion (2*l), so a static unroll keeps
    # every gate index constant and gives the scheduler full visibility.
    for g in range(L):
        Gr = gates_ref[g, 0]                        # (D, D) = real(G^T)
        Gi = gates_ref[g, 1]                        # (D, D) = imag(G^T)
        new_re = (jnp.dot(re, Gr, preferred_element_type=jnp.float32)
                  - jnp.dot(im, Gi, preferred_element_type=jnp.float32))
        new_im = (jnp.dot(re, Gi, preferred_element_type=jnp.float32)
                  + jnp.dot(im, Gr, preferred_element_type=jnp.float32))
        re, im = new_re, new_im

    out_ref[...] = re * re + im * im                # ops.prob


def run_circuit(gates_packed):
    L, _, D, _ = gates_packed.shape
    out = pl.pallas_call(
        circuit_kernel,
        out_shape=jax.ShapeDtypeStruct((1, D), jnp.float32),
        grid_spec=pltpu.PrefetchScalarGridSpec(
            num_scalar_prefetch=0,
            grid=(1,),                              # single step: one DMA, no per-gate grid overhead
            in_specs=[pl.BlockSpec((L, 2, D, D), lambda i: (0, 0, 0, 0))],
            out_specs=pl.BlockSpec((1, D), lambda i: (0, 0)),
        ),
        compiler_params=pltpu.CompilerParams(
            dimension_semantics=("arbitrary",)),
    )(gates_packed)
    return out.reshape(D)


# ----------------------------------------------------------------------------
if __name__ == "__main__":
    # Small, deterministic configuration: n=2 qudits of dimension 4, l=2 layers.
    n, l, dim = 2, 2, 4
    D = dim ** n                                    # 16 amplitudes

    np.random.seed(0)                               # drives the random circuit structure
    n_rot = l * n
    thetas = np.asarray(
        jax.random.uniform(jax.random.PRNGKey(0), (n_rot,),
                           minval=0.0, maxval=2.0 * np.pi))

    raw_gates = build_model3_gates(n, l, dim, thetas)   # literal Model3 gate list
    fused = fuse_layers(raw_gates, n, l)                # 2*l fused matrices
    gates_packed = pack_gates(fused)                    # (2*l, 2, D, D) f32

    probs = jax.block_until_ready(run_circuit(gates_packed))

    # Reference (pure numpy) check against the literal, un-fused gate chain,
    # i.e. exactly what Model3's nn.Sequential applies.
    psi = np.zeros((D,), dtype=np.complex128)
    psi[0] = 1.0
    for Gk in raw_gates:
        psi = Gk @ psi
    ref = np.abs(psi) ** 2

    np.testing.assert_allclose(np.asarray(probs), ref, rtol=1e-4, atol=1e-5)
    assert abs(float(np.sum(np.asarray(probs))) - 1.0) < 1e-4

    print("KERNEL_OK")
</pallas_src>

<mosaic_0001>
module attributes {stable_mosaic.version = 11 : i64} {
  func.func @circuit_kernel(%arg0: i32, %arg1: memref<4x2x16x16xf32, #tpu.memory_space<vmem>>, %arg2: memref<1x16xf32, #tpu.memory_space<vmem>>) attributes {dimension_semantics = [#tpu.dimension_semantics<arbitrary>], iteration_bounds = array<i64: 1>, scalar_prefetch = 0 : i64, scratch_operands = 0 : i64, tpu.core_type = #tpu.core_type<tc>, window_params = [{pipeline_mode = #tpu.pipeline_mode<synchronous>, transform_indices = @transform_0, window_bounds = array<i64: 4, 2, 16, 16>}, {pipeline_mode = #tpu.pipeline_mode<synchronous>, transform_indices = @transform_1, window_bounds = array<i64: 1, 16>}]} {
    %0 = tpu.iota {dimensions = array<i32: 1>} : vector<1x16xi32>
    %c0_i32 = arith.constant 0 : i32
    %1 = vector.broadcast %c0_i32 : i32 to vector<1x16xi32>
    %2 = arith.cmpi eq, %0, %1 : vector<1x16xi32>
    %cst = arith.constant 1.000000e+00 : f32
    %cst_0 = arith.constant 0.000000e+00 : f32
    %3 = vector.broadcast %cst : f32 to vector<1x16xf32>
    %4 = vector.broadcast %cst_0 : f32 to vector<1x16xf32>
    %5 = arith.select %2, %3, %4 : vector<1x16xi1>, vector<1x16xf32>
    %cst_1 = arith.constant 0.000000e+00 : f32
    %6 = vector.broadcast %cst_1 : f32 to vector<1x16xf32>
    %c0 = arith.constant 0 : index
    %c0_2 = arith.constant 0 : index
    %c0_3 = arith.constant 0 : index
    %c0_4 = arith.constant 0 : index
    %7 = vector.load %arg1[%c0, %c0_2, %c0_3, %c0_4] : memref<4x2x16x16xf32, #tpu.memory_space<vmem>>, vector<1x1x16x16xf32>
    %8 = vector.shape_cast %7 : vector<1x1x16x16xf32> to vector<16x16xf32>
    %c0_5 = arith.constant 0 : index
    %c1 = arith.constant 1 : index
    %c0_6 = arith.constant 0 : index
    %c0_7 = arith.constant 0 : index
    %9 = vector.load %arg1[%c0_5, %c1, %c0_6, %c0_7] : memref<4x2x16x16xf32, #tpu.memory_space<vmem>>, vector<1x1x16x16xf32>
    %10 = vector.shape_cast %9 : vector<1x1x16x16xf32> to vector<16x16xf32>
    %cst_8 = arith.constant dense<0.000000e+00> : vector<1x16xf32>
    %11 = tpu.matmul %5, %8, %cst_8 {dimension_numbers = #tpu.dot_dimension_numbers<[1], [0], [0], [1], [0, 0, 1, 1], [], []>} : vector<1x16xf32>, vector<16x16xf32>, vector<1x16xf32> -> vector<1x16xf32>
    %cst_9 = arith.constant dense<0.000000e+00> : vector<1x16xf32>
    %12 = tpu.matmul %6, %10, %cst_9 {dimension_numbers = #tpu.dot_dimension_numbers<[1], [0], [0], [1], [0, 0, 1, 1], [], []>} : vector<1x16xf32>, vector<16x16xf32>, vector<1x16xf32> -> vector<1x16xf32>
    %13 = arith.subf %11, %12 : vector<1x16xf32>
    %cst_10 = arith.constant dense<0.000000e+00> : vector<1x16xf32>
    %14 = tpu.matmul %5, %10, %cst_10 {dimension_numbers = #tpu.dot_dimension_numbers<[1], [0], [0], [1], [0, 0, 1, 1], [], []>} : vector<1x16xf32>, vector<16x16xf32>, vector<1x16xf32> -> vector<1x16xf32>
    %cst_11 = arith.constant dense<0.000000e+00> : vector<1x16xf32>
    %15 = tpu.matmul %6, %8, %cst_11 {dimension_numbers = #tpu.dot_dimension_numbers<[1], [0], [0], [1], [0, 0, 1, 1], [], []>} : vector<1x16xf32>, vector<16x16xf32>, vector<1x16xf32> -> vector<1x16xf32>
    %16 = arith.addf %14, %15 : vector<1x16xf32>
    %c1_12 = arith.constant 1 : index
    %c0_13 = arith.constant 0 : index
    %c0_14 = arith.constant 0 : index
    %c0_15 = arith.constant 0 : index
    %17 = vector.load %arg1[%c1_12, %c0_13, %c0_14, %c0_15] : memref<4x2x16x16xf32, #tpu.memory_space<vmem>>, vector<1x1x16x16xf32>
    %18 = vector.shape_cast %17 : vector<1x1x16x16xf32> to vector<16x16xf32>
    %c1_16 = arith.constant 1 : index
    %c1_17 = arith.constant 1 : index
    %c0_18 = arith.constant 0 : index
    %c0_19 = arith.constant 0 : index
    %19 = vector.load %arg1[%c1_16, %c1_17, %c0_18, %c0_19] : memref<4x2x16x16xf32, #tpu.memory_space<vmem>>, vector<1x1x16x16xf32>
    %20 = vector.shape_cast %19 : vector<1x1x16x16xf32> to vector<16x16xf32>
    %cst_20 = arith.constant dense<0.000000e+00> : vector<1x16xf32>
    %21 = tpu.matmul %13, %18, %cst_20 {dimension_numbers = #tpu.dot_dimension_numbers<[1], [0], [0], [1], [0, 0, 1, 1], [], []>} : vector<1x16xf32>, vector<16x16xf32>, vector<1x16xf32> -> vector<1x16xf32>
    %cst_21 = arith.constant dense<0.000000e+00> : vector<1x16xf32>
    %22 = tpu.matmul %16, %20, %cst_21 {dimension_numbers = #tpu.dot_dimension_numbers<[1], [0], [0], [1], [0, 0, 1, 1], [], []>} : vector<1x16xf32>, vector<16x16xf32>, vector<1x16xf32> -> vector<1x16xf32>
    %23 = arith.subf %21, %22 : vector<1x16xf32>
    %cst_22 = arith.constant dense<0.000000e+00> : vector<1x16xf32>
    %24 = tpu.matmul %13, %20, %cst_22 {dimension_numbers = #tpu.dot_dimension_numbers<[1], [0], [0], [1], [0, 0, 1, 1], [], []>} : vector<1x16xf32>, vector<16x16xf32>, vector<1x16xf32> -> vector<1x16xf32>
    %cst_23 = arith.constant dense<0.000000e+00> : vector<1x16xf32>
    %25 = tpu.matmul %16, %18, %cst_23 {dimension_numbers = #tpu.dot_dimension_numbers<[1], [0], [0], [1], [0, 0, 1, 1], [], []>} : vector<1x16xf32>, vector<16x16xf32>, vector<1x16xf32> -> vector<1x16xf32>
    %26 = arith.addf %24, %25 : vector<1x16xf32>
    %c2 = arith.constant 2 : index
    %c0_24 = arith.constant 0 : index
    %c0_25 = arith.constant 0 : index
    %c0_26 = arith.constant 0 : index
    %27 = vector.load %arg1[%c2, %c0_24, %c0_25, %c0_26] : memref<4x2x16x16xf32, #tpu.memory_space<vmem>>, vector<1x1x16x16xf32>
    %28 = vector.shape_cast %27 : vector<1x1x16x16xf32> to vector<16x16xf32>
    %c2_27 = arith.constant 2 : index
    %c1_28 = arith.constant 1 : index
    %c0_29 = arith.constant 0 : index
    %c0_30 = arith.constant 0 : index
    %29 = vector.load %arg1[%c2_27, %c1_28, %c0_29, %c0_30] : memref<4x2x16x16xf32, #tpu.memory_space<vmem>>, vector<1x1x16x16xf32>
    %30 = vector.shape_cast %29 : vector<1x1x16x16xf32> to vector<16x16xf32>
    %cst_31 = arith.constant dense<0.000000e+00> : vector<1x16xf32>
    %31 = tpu.matmul %23, %28, %cst_31 {dimension_numbers = #tpu.dot_dimension_numbers<[1], [0], [0], [1], [0, 0, 1, 1], [], []>} : vector<1x16xf32>, vector<16x16xf32>, vector<1x16xf32> -> vector<1x16xf32>
    %cst_32 = arith.constant dense<0.000000e+00> : vector<1x16xf32>
    %32 = tpu.matmul %26, %30, %cst_32 {dimension_numbers = #tpu.dot_dimension_numbers<[1], [0], [0], [1], [0, 0, 1, 1], [], []>} : vector<1x16xf32>, vector<16x16xf32>, vector<1x16xf32> -> vector<1x16xf32>
    %33 = arith.subf %31, %32 : vector<1x16xf32>
    %cst_33 = arith.constant dense<0.000000e+00> : vector<1x16xf32>
    %34 = tpu.matmul %23, %30, %cst_33 {dimension_numbers = #tpu.dot_dimension_numbers<[1], [0], [0], [1], [0, 0, 1, 1], [], []>} : vector<1x16xf32>, vector<16x16xf32>, vector<1x16xf32> -> vector<1x16xf32>
    %cst_34 = arith.constant dense<0.000000e+00> : vector<1x16xf32>
    %35 = tpu.matmul %26, %28, %cst_34 {dimension_numbers = #tpu.dot_dimension_numbers<[1], [0], [0], [1], [0, 0, 1, 1], [], []>} : vector<1x16xf32>, vector<16x16xf32>, vector<1x16xf32> -> vector<1x16xf32>
    %36 = arith.addf %34, %35 : vector<1x16xf32>
    %c3 = arith.constant 3 : index
    %c0_35 = arith.constant 0 : index
    %c0_36 = arith.constant 0 : index
    %c0_37 = arith.constant 0 : index
    %37 = vector.load %arg1[%c3, %c0_35, %c0_36, %c0_37] : memref<4x2x16x16xf32, #tpu.memory_space<vmem>>, vector<1x1x16x16xf32>
    %38 = vector.shape_cast %37 : vector<1x1x16x16xf32> to vector<16x16xf32>
    %c3_38 = arith.constant 3 : index
    %c1_39 = arith.constant 1 : index
    %c0_40 = arith.constant 0 : index
    %c0_41 = arith.constant 0 : index
    %39 = vector.load %arg1[%c3_38, %c1_39, %c0_40, %c0_41] : memref<4x2x16x16xf32, #tpu.memory_space<vmem>>, vector<1x1x16x16xf32>
    %40 = vector.shape_cast %39 : vector<1x1x16x16xf32> to vector<16x16xf32>
    %cst_42 = arith.constant dense<0.000000e+00> : vector<1x16xf32>
    %41 = tpu.matmul %33, %38, %cst_42 {dimension_numbers = #tpu.dot_dimension_numbers<[1], [0], [0], [1], [0, 0, 1, 1], [], []>} : vector<1x16xf32>, vector<16x16xf32>, vector<1x16xf32> -> vector<1x16xf32>
    %cst_43 = arith.constant dense<0.000000e+00> : vector<1x16xf32>
    %42 = tpu.matmul %36, %40, %cst_43 {dimension_numbers = #tpu.dot_dimension_numbers<[1], [0], [0], [1], [0, 0, 1, 1], [], []>} : vector<1x16xf32>, vector<16x16xf32>, vector<1x16xf32> -> vector<1x16xf32>
    %43 = arith.subf %41, %42 : vector<1x16xf32>
    %cst_44 = arith.constant dense<0.000000e+00> : vector<1x16xf32>
    %44 = tpu.matmul %33, %40, %cst_44 {dimension_numbers = #tpu.dot_dimension_numbers<[1], [0], [0], [1], [0, 0, 1, 1], [], []>} : vector<1x16xf32>, vector<16x16xf32>, vector<1x16xf32> -> vector<1x16xf32>
    %cst_45 = arith.constant dense<0.000000e+00> : vector<1x16xf32>
    %45 = tpu.matmul %36, %38, %cst_45 {dimension_numbers = #tpu.dot_dimension_numbers<[1], [0], [0], [1], [0, 0, 1, 1], [], []>} : vector<1x16xf32>, vector<16x16xf32>, vector<1x16xf32> -> vector<1x16xf32>
    %46 = arith.addf %44, %45 : vector<1x16xf32>
    %47 = arith.mulf %43, %43 : vector<1x16xf32>
    %48 = arith.mulf %46, %46 : vector<1x16xf32>
    %49 = arith.addf %47, %48 : vector<1x16xf32>
    %c0_46 = arith.constant 0 : index
    %c0_47 = arith.constant 0 : index
    %50 = vector.load %arg2[%c0_46, %c0_47] : memref<1x16xf32, #tpu.memory_space<vmem>>, vector<1x16xf32>
    tpu.vector_store %arg2[%c0_46, %c0_47], %49 {strides = array<i32>} : memref<1x16xf32, #tpu.memory_space<vmem>>, vector<1x16xf32>,
    return
  }
  func.func @transform_0(%arg0: i32) -> (i32, i32, i32, i32) {
    %c0_i32 = arith.constant 0 : i32
    %c0_i32_0 = arith.constant 0 : i32
    %c0_i32_1 = arith.constant 0 : i32
    %c0_i32_2 = arith.constant 0 : i32
    %c0_i32_3 = arith.constant 0 : i32
    return %c0_i32, %c0_i32_0, %c0_i32_1, %c0_i32_2 : i32, i32, i32, i32
  }
  func.func @transform_1(%arg0: i32) -> (i32, i32) {
    %c0_i32 = arith.constant 0 : i32
    %c0_i32_0 = arith.constant 0 : i32
    %c0_i32_1 = arith.constant 0 : i32
    return %c0_i32, %c0_i32_0 : i32, i32
  }
}

</mosaic_0001>

<bundles_post_ra>
// kernel: tpu_custom_call.1
= control target key start
LH: loop header
LB: loop body
LE: loop exit
PB: predicated region body
PF: predicated region fallthrough
CT: control target
= control target key end

     0   :  { %6 = vsyncpa [#allocation3], 0  ;;  %s529_s0 = inlined_call_operand.hbm [shape: f32[4,2,16,16], index: 0, kind: input, shape index: {}]   ;;  %s530_s1 = inlined_call_operand.hbm [shape: f32[1,16], index: 1, kind: output, shape index: {}]  }
   0x1   :  { %7 = vsyncpa [#allocation4], 0  ;;  %s12_s8 = sshll.u32 %s529_s0, 4  ;;  %s494_s9 = smov [#allocation2]   ;;  %s13_s8 = int_to_ptr.hbm [resolvable:$true] %s12_s8 }
   0x2   :  { %s14_s10 = sshll.u32 %s494_s9, 4  ;;  %s495_s11 = smov 128   ;;  %s15_s10 = int_to_ptr.vmem [resolvable:$true] %s14_s10 }
   0x3   :  { %s496_s12 = smov 8  }
   0x4   :  { %20 = dma.hbm_to_vmem [thread:$0]  %s13_s8, 2048, %s15_s10, [#allocation3], %s495_s11, %s495_s11, %s496_s12  }
   0x5   :  { %490 = dma.done.wait [#allocation3], 2048  }
   0x6   :  { %491 = vsyncadd [#allocation3], 4294965248  ;;  %v25_v0 = vlaneseq  ;;  %v30_v2 = vld [vmem:[#allocation2 + $0x8] sm:$0xff]  ;;  %v33_v3 = vld [vmem:[#allocation2 + $0x18] sm:$0xff]  ;;  %v497_v6 = vmov 0.0   ;;  %vm34_vm1 = vcmask 130048  }
   0x7   :  { %v29_v4 = vld [vmem:[#allocation2] sm:$0xff]  ;;  %96 = vmatpush.msra.mxu2 %v30_v2  ;;  %116 = vmatpush.msra.mxu3 %v33_v3  ;;  %v32_v5 = vld [vmem:[#allocation2 + $0x10] sm:$0xff]  ;;  %v124_v8 = vld [vmem:[#allocation2 + $0x28] sm:$0xff]  ;;  %s498_s0 = smov [#allocation5]   ;;  %s413_s16 = sshll.u32 %s530_s1, 4  ;;  %vm404_vm2 = vcmask 122880   ;;  %s414_s16 = int_to_ptr.hbm [resolvable:$true] %s413_s16 }
   0x8   :  { %v26_v1 = vand.u32 127, %v25_v0  ;;  %52 = vmatpush.msra.mxu0 %v30_v2  ;;  %75 = vmatpush.msra.mxu1 %v33_v3  ;;  %v127_v9 = vld [vmem:[#allocation2 + $0x38] sm:$0xff]  ;;  %v123_v10 = vld [vmem:[#allocation2 + $0x20] sm:$0xff]  ;;  %v126_v11 = vld [vmem:[#allocation2 + $0x30] sm:$0xff]  ;;  %s411_s13 = sshll.u32 %s498_s0, 4  ;;  %s412_s13 = int_to_ptr.vmem [resolvable:$true] %s411_s13 }
   0x9   :  { %97 = vmatpush.msra.mxu2 %v29_v4  ;;  %117 = vmatpush.msra.mxu3 %v32_v5  ;;  %v217_v18 = vld [vmem:[#allocation2 + $0x48] sm:$0xff]  ;;  %v220_v19 = vld [vmem:[#allocation2 + $0x58] sm:$0xff]  ;;  %v216_v20 = vld [vmem:[#allocation2 + $0x40] sm:$0xff] }
   0xa   :  { %vm27_vm0 = vcmp.eq.s32.totalorder %v26_v1, 0  ;;  %98 = vmatmul.f32.vlgmr.msra.gmra.mxu2 %v497_v6  ;;  %53 = vmatpush.msra.mxu0 %v29_v4  ;;  %v219_v21 = vld [vmem:[#allocation2 + $0x50] sm:$0xff]  ;;  %v310_v28 = vld [vmem:[#allocation2 + $0x68] sm:$0xff]  ;;  %v313_v29 = vld [vmem:[#allocation2 + $0x78] sm:$0xff] }
   0xb   :  { %v28_v7 = vsel %vm27_vm0, 1.0, %v497_v6  ;;  %76 = vmatpush.msra.mxu1 %v32_v5  ;;  %189 = vmatpush.msrb.mxu2 %v124_v8  ;;  %v309_v30 = vld [vmem:[#allocation2 + $0x60] sm:$0xff]  ;;  %v312_v31 = vld [vmem:[#allocation2 + $0x70] sm:$0xff] }
   0xc   :  { %424 = vmatmul.msk.f32.vlgmr.msra.gmra.mxu3 %vm34_vm1, %v28_v7  ;;  %423 = vmatmul.msk.f32.vlgmr.msra.gmra.mxu0 %vm34_vm1, %v28_v7 }
   0xd   :  { %77 = vmatmul.f32.vlgmr.msra.gmra.mxu1 %v497_v6  ;;  %209 = vmatpush.msrb.mxu3 %v127_v9 }
   0xe   :  { %145 = vmatpush.msrb.mxu0 %v124_v8  ;;  %168 = vmatpush.msrb.mxu1 %v127_v9 }
   0xf   :  { %190 = vmatpush.msrb.mxu2 %v123_v10  ;;  %210 = vmatpush.msrb.mxu3 %v126_v11 }
  0x10   :  { %146 = vmatpush.msrb.mxu0 %v123_v10  ;;  %169 = vmatpush.msrb.mxu1 %v126_v11 }
  0x11   :  { %302 = vmatpush.msra.mxu3 %v220_v19  ;;  %282 = vmatpush.msra.mxu2 %v217_v18 }
  0x12   :  { %238 = vmatpush.msra.mxu0 %v217_v18  ;;  %261 = vmatpush.msra.mxu1 %v220_v19 }
  0x13   :  { %303 = vmatpush.msra.mxu3 %v219_v21  ;;  %283 = vmatpush.msra.mxu2 %v216_v20 }
  0x14   :  { %239 = vmatpush.msra.mxu0 %v216_v20  ;;  %262 = vmatpush.msra.mxu1 %v219_v21 }
  0x89   :  { %v55_v12 = vpop.f32.mrf.mxu0 }
  0x8a   :  { %v78_v13 = vpop.f32.mrf.mxu1 }
  0x8b   :  { %v81_v14 = vsub.f32 %v55_v12, %v78_v13 }
  0x8d   :  { %425 = vmatmul.msk.f32.vlgmr.msrb.gmra.mxu0 %vm34_vm1, %v81_v14  ;;  %428 = vmatmul.msk.f32.vlgmr.msrb.gmra.mxu3 %vm34_vm1, %v81_v14  ;;  %v99_v15 = vpop.f32.mrf.mxu2 }
  0x8e   :  { %331 = vmatpush.msrb.mxu0 %v310_v28  ;;  %395 = vmatpush.msrb.mxu3 %v313_v29 }
  0x8f   :  { %v119_v16 = vpop.f32.mrf.mxu3 }
  0x90   :  { %v120_v17 = vadd.f32 %v119_v16, %v99_v15  ;;  %332 = vmatpush.msrb.mxu0 %v309_v30  ;;  %396 = vmatpush.msrb.mxu3 %v312_v31 }
  0x92   :  { %426 = vmatmul.msk.f32.vlgmr.msrb.gmra.mxu1 %vm34_vm1, %v120_v17  ;;  %427 = vmatmul.msk.f32.vlgmr.msrb.gmra.mxu2 %vm34_vm1, %v120_v17 }
  0x93   :  { %375 = vmatpush.msrb.mxu2 %v310_v28  ;;  %354 = vmatpush.msrb.mxu1 %v313_v29 }
  0x95   :  { %376 = vmatpush.msrb.mxu2 %v309_v30  ;;  %355 = vmatpush.msrb.mxu1 %v312_v31 }
 0x10a   :  { %v148_v22 = vpop.f32.mrf.mxu0 }
 0x10f   :  { %v171_v23 = vpop.f32.mrf.mxu1 }
 0x110   :  { %v174_v24 = vsub.f32 %v148_v22, %v171_v23  ;;  %v212_v25 = vpop.f32.mrf.mxu3 }
 0x112   :  { %429 = vmatmul.msk.f32.vlgmr.msra.gmra.mxu0 %vm34_vm1, %v174_v24  ;;  %432 = vmatmul.msk.f32.vlgmr.msra.gmra.mxu3 %vm34_vm1, %v174_v24 }
 0x115   :  { %v192_v26 = vpop.f32.mrf.mxu2 }
 0x116   :  { %v213_v27 = vadd.f32 %v212_v25, %v192_v26 }
 0x118   :  { %430 = vmatmul.msk.f32.vlgmr.msra.gmra.mxu1 %vm34_vm1, %v213_v27  ;;  %431 = vmatmul.msk.f32.vlgmr.msra.gmra.mxu2 %vm34_vm1, %v213_v27 }
 0x18f   :  { %v241_v32 = vpop.f32.mrf.mxu0 }
 0x195   :  { %v264_v33 = vpop.f32.mrf.mxu1  ;;  %v305_v35 = vpop.f32.mrf.mxu3 }
 0x196   :  { %v267_v34 = vsub.f32 %v241_v32, %v264_v33 }
 0x198   :  { %433 = vmatmul.msk.f32.vlgmr.msrb.gmra.mxu0 %vm34_vm1, %v267_v34  ;;  %436 = vmatmul.msk.f32.vlgmr.msrb.gmra.mxu3 %vm34_vm1, %v267_v34 }
 0x19b   :  { %v285_v36 = vpop.f32.mrf.mxu2 }
 0x19c   :  { %v306_v37 = vadd.f32 %v305_v35, %v285_v36 }
 0x19e   :  { %434 = vmatmul.msk.f32.vlgmr.msrb.gmra.mxu1 %vm34_vm1, %v306_v37  ;;  %435 = vmatmul.msk.f32.vlgmr.msrb.gmra.mxu2 %vm34_vm1, %v306_v37 }
 0x215   :  { %v334_v39 = vpop.f32.mrf.mxu0 }
 0x21b   :  { %v357_v38 = vpop.f32.mrf.mxu1  ;;  %v398_v41 = vpop.f32.mrf.mxu3 }
 0x21c   :  { %v360_v40 = vsub.f32 %v334_v39, %v357_v38 }
 0x21e   :  { %v401_v44 = vmul.f32 %v360_v40, %v360_v40 }
 0x221   :  { %v378_v42 = vpop.f32.mrf.mxu2 }
 0x222   :  { %v399_v43 = vadd.f32 %v398_v41, %v378_v42 }
 0x224   :  { %v402_v45 = vmul.f32 %v399_v43, %v399_v43 }
 0x226   :  { %v403_v46 = vadd.f32 %v402_v45, %v401_v44 }
 0x228   :  { %405 = vst.msk [vmem:[#allocation5] sm:$0x1] %vm404_vm2, %v403_v46 }
 0x229   :  { %416 = dma.vmem_to_hbm [thread:$0]  %s412_s13, 16, %s414_s16, [#allocation4]  }
 0x22a   :  { %492 = dma.done.wait [#allocation4], 16  }
 0x22b   :  { %493 = vsyncadd [#allocation4], 4294967280 }
 0x22c   :  { %421 = vsyncpa [#allocation3], 1 }
 0x22d   :  { %422 = vsyncpa [#allocation4], 1 }

</bundles_post_ra>
